<compile_context>
chip_gen: v6e
topology: v6e:2x2x1
jax: 0.10.0
libtpu: 0.0.40
codegen_flags: <defaults>
</compile_context>

<pallas_src>
import functools

import jax
import jax.numpy as jnp
from jax.experimental import pallas as pl
from jax.experimental.pallas import tpu as pltpu


def _round_up(x: int, m: int) -> int:
    return ((x + m - 1) // m) * m


def _pick_tile(dim: int, align: int, candidates=(512, 384, 256, 128)) -> int:
    """Pick a tile size (multiple of `align`, clamped to the dim) that
    minimizes zero-padding waste; prefer the larger tile on ties."""
    dim_al = _round_up(dim, align)
    best_t, best_waste = None, None
    for c in candidates:
        t = min(_round_up(c, align), dim_al)
        waste = _round_up(dim, t) - dim
        if (best_waste is None or waste < best_waste
                or (waste == best_waste and t > best_t)):
            best_t, best_waste = t, waste
    return best_t


def _pad2(x, rows: int, cols: int):
    pr, pc = rows - x.shape[0], cols - x.shape[1]
    if pr == 0 and pc == 0:
        return x  # already aligned: no extra HBM pass
    return jnp.pad(x, ((0, pr), (0, pc)))


def _fused_mm_add_kernel(x1_ref, x2_ref, inp1_ref, inp2_ref, o_ref, *, kt1):
    # Segmented-K accumulation directly into the f32 output block.
    k = pl.program_id(2)

    @pl.when(k == 0)
    def _():
        o_ref[...] = jnp.zeros_like(o_ref)

    @pl.when(k < kt1)
    def _():
        o_ref[...] += jnp.dot(
            x1_ref[...], x2_ref[...], preferred_element_type=jnp.float32
        )

    @pl.when(k >= kt1)
    def _():
        o_ref[...] += jnp.dot(
            inp1_ref[...], inp2_ref[...], preferred_element_type=jnp.float32
        )


def fused_mm_add(x1, x2, inp1, inp2):
    """inp1 @ inp2 + x1 @ x2 as one tiled Pallas matmul with a segmented K grid."""
    M, K1 = x1.shape
    K1b, N = x2.shape
    Mb, K2 = inp1.shape
    K2b, Nb = inp2.shape
    assert K1 == K1b and K2 == K2b and M == Mb and N == Nb

    # Sublane alignment for the M axis depends on operand itemsize
    # (8 rows for 4-byte dtypes, 16 for 2-byte like bf16).
    min_itemsize = min(x1.dtype.itemsize, inp1.dtype.itemsize)
    m_align = 8 if min_itemsize >= 4 else 16

    tm = _pick_tile(M, m_align)
    tn = _pick_tile(N, 128)
    tk1 = _pick_tile(K1, 128)
    tk2 = _pick_tile(K2, 128)

    Mp = _round_up(M, tm)
    Np = _round_up(N, tn)
    K1p = _round_up(K1, tk1)
    K2p = _round_up(K2, tk2)

    kt1 = K1p // tk1
    kt2 = K2p // tk2

    # Zero-pad only when misaligned (zeros contribute nothing to the dot).
    x1p = _pad2(x1, Mp, K1p)
    x2p = _pad2(x2, K1p, Np)
    inp1p = _pad2(inp1, Mp, K2p)
    inp2p = _pad2(inp2, K2p, Np)

    grid = (Mp // tm, Np // tn, kt1 + kt2)

    flops = 2 * Mp * Np * (K1p + K2p)
    bytes_accessed = (
        x1p.size * x1p.dtype.itemsize
        + x2p.size * x2p.dtype.itemsize
        + inp1p.size * inp1p.dtype.itemsize
        + inp2p.size * inp2p.dtype.itemsize
        + Mp * Np * 4
    )

    # Clamped index maps: during the inp-segment the x-pair keeps its last
    # block index (no re-fetch), and vice versa during the x-segment.
    x1_map = lambda i, j, k: (i, jnp.minimum(k, kt1 - 1))
    x2_map = lambda i, j, k: (jnp.minimum(k, kt1 - 1), j)
    inp1_map = lambda i, j, k: (i, jnp.maximum(k - kt1, 0))
    inp2_map = lambda i, j, k: (jnp.maximum(k - kt1, 0), j)

    out = pl.pallas_call(
        functools.partial(_fused_mm_add_kernel, kt1=kt1),
        out_shape=jax.ShapeDtypeStruct((Mp, Np), jnp.float32),
        grid_spec=pltpu.PrefetchScalarGridSpec(
            num_scalar_prefetch=0,
            grid=grid,
            in_specs=[
                pl.BlockSpec((tm, tk1), x1_map),
                pl.BlockSpec((tk1, tn), x2_map),
                pl.BlockSpec((tm, tk2), inp1_map),
                pl.BlockSpec((tk2, tn), inp2_map),
            ],
            out_specs=pl.BlockSpec((tm, tn), lambda i, j, k: (i, j)),
        ),
        compiler_params=pltpu.CompilerParams(
            # M/N tiles independent -> shard across TensorCores; K is the
            # reduction axis (last in the grid) -> arbitrary.
            dimension_semantics=("parallel", "parallel", "arbitrary"),
            # Safe on v5e/v6e (128 MiB phys) and v7x (64 MiB phys); ample
            # for <=512-wide f32 tiles with double buffering (~11 MiB).
            vmem_limit_bytes=48 * 1024 * 1024,
        ),
        cost_estimate=pl.CostEstimate(
            flops=flops, transcendentals=0, bytes_accessed=bytes_accessed
        ),
    )(x1p, x2p, inp1p, inp2p)

    if Mp != M or Np != N:
        out = out[:M, :N]
    return out


def _check(key, M, K1, N, K2):
    k1, k2, k3, k4 = jax.random.split(key, 4)
    x1 = jax.random.normal(k1, (M, K1), dtype=jnp.float32)
    x2 = jax.random.normal(k2, (K1, N), dtype=jnp.float32)
    inp1 = jax.random.normal(k3, (M, K2), dtype=jnp.float32)
    inp2 = jax.random.normal(k4, (K2, N), dtype=jnp.float32)

    out = jax.jit(fused_mm_add)(x1, x2, inp1, inp2)
    jax.block_until_ready(out)
    assert out.shape == (M, N)

    ref = (
        jnp.dot(inp1, inp2, precision=jax.lax.Precision.HIGHEST)
        + jnp.dot(x1, x2, precision=jax.lax.Precision.HIGHEST)
    )
    max_err = float(jnp.max(jnp.abs(out - ref)))
    scale = float(jnp.max(jnp.abs(ref))) + 1e-6
    assert max_err <= 1e-2 * scale + 1e-3, (
        f"mismatch at M={M} K1={K1} N={N} K2={K2}: err={max_err}, scale={scale}"
    )


if __name__ == "__main__":
    key = jax.random.PRNGKey(0)
    ka, kb = jax.random.split(key)

    # Small shapes in the spirit of the original module (the file's literal
    # shapes are mutually inconsistent): both products must be (6, 6).
    _check(ka, M=6, K1=3, N=6, K2=6)

    # Moderate shapes exercising multiple N tiles and both K segments
    # (K1 spans two K-steps, K2 one).
    _check(kb, M=264, K1=768, N=640, K2=320)

    print("KERNEL_OK")
</pallas_src>

<mosaic_0001>
module attributes {stable_mosaic.version = 11 : i64} {
  func.func @_fused_mm_add_kernel(%arg0: i32, %arg1: i32, %arg2: i32, %arg3: memref<8x128xf32, #tpu.memory_space<vmem>>, %arg4: memref<128x128xf32, #tpu.memory_space<vmem>>, %arg5: memref<8x128xf32, #tpu.memory_space<vmem>>, %arg6: memref<128x128xf32, #tpu.memory_space<vmem>>, %arg7: memref<8x128xf32, #tpu.memory_space<vmem>>) attributes {dimension_semantics = [#tpu.dimension_semantics<parallel>, #tpu.dimension_semantics<parallel>, #tpu.dimension_semantics<arbitrary>], iteration_bounds = array<i64: 1, 1, 2>, scalar_prefetch = 0 : i64, scratch_operands = 0 : i64, tpu.core_type = #tpu.core_type<tc>, window_params = [{transform_indices = @transform_0, window_bounds = array<i64: 8, 128>}, {transform_indices = @transform_1, window_bounds = array<i64: 128, 128>}, {transform_indices = @transform_2, window_bounds = array<i64: 8, 128>}, {transform_indices = @transform_3, window_bounds = array<i64: 128, 128>}, {transform_indices = @transform_4, window_bounds = array<i64: 8, 128>}]} {
    %c0_i32 = arith.constant 0 : i32
    %0 = arith.cmpi eq, %arg2, %c0_i32 : i32
    %1 = arith.extui %0 : i1 to i32
    %c0_i32_0 = arith.constant 0 : i32
    %2 = arith.cmpi ne, %1, %c0_i32_0 : i32
    scf.if %2 {
      %cst = arith.constant 0.000000e+00 : f32
      %9 = vector.broadcast %cst : f32 to vector<8x128xf32>
      %c0 = arith.constant 0 : index
      %c0_4 = arith.constant 0 : index
      %10 = vector.load %arg7[%c0, %c0_4] : memref<8x128xf32, #tpu.memory_space<vmem>>, vector<8x128xf32>
      tpu.vector_store %arg7[%c0, %c0_4], %9 {strides = array<i32>} : memref<8x128xf32, #tpu.memory_space<vmem>>, vector<8x128xf32>,
    } else {
    }
    %c1_i32 = arith.constant 1 : i32
    %3 = arith.cmpi slt, %arg2, %c1_i32 : i32
    %4 = arith.extui %3 : i1 to i32
    %c0_i32_1 = arith.constant 0 : i32
    %5 = arith.cmpi ne, %4, %c0_i32_1 : i32
    scf.if %5 {
      %c0 = arith.constant 0 : index
      %c0_4 = arith.constant 0 : index
      %9 = vector.load %arg7[%c0, %c0_4] : memref<8x128xf32, #tpu.memory_space<vmem>>, vector<8x128xf32>
      %c0_5 = arith.constant 0 : index
      %c0_6 = arith.constant 0 : index
      %10 = vector.load %arg3[%c0_5, %c0_6] : memref<8x128xf32, #tpu.memory_space<vmem>>, vector<8x128xf32>
      %c0_7 = arith.constant 0 : index
      %c0_8 = arith.constant 0 : index
      %11 = vector.load %arg4[%c0_7, %c0_8] : memref<128x128xf32, #tpu.memory_space<vmem>>, vector<128x128xf32>
      %cst = arith.constant dense<0.000000e+00> : vector<8x128xf32>
      %12 = tpu.matmul %10, %11, %cst {dimension_numbers = #tpu.dot_dimension_numbers<[1], [0], [0], [1], [0, 0, 1, 1], [], []>} : vector<8x128xf32>, vector<128x128xf32>, vector<8x128xf32> -> vector<8x128xf32>
      %13 = arith.addf %9, %12 : vector<8x128xf32>
      %c0_9 = arith.constant 0 : index
      %c0_10 = arith.constant 0 : index
      %14 = vector.load %arg7[%c0_9, %c0_10] : memref<8x128xf32, #tpu.memory_space<vmem>>, vector<8x128xf32>
      tpu.vector_store %arg7[%c0_9, %c0_10], %13 {strides = array<i32>} : memref<8x128xf32, #tpu.memory_space<vmem>>, vector<8x128xf32>,
    } else {
    }
    %c1_i32_2 = arith.constant 1 : i32
    %6 = arith.cmpi sge, %arg2, %c1_i32_2 : i32
    %7 = arith.extui %6 : i1 to i32
    %c0_i32_3 = arith.constant 0 : i32
    %8 = arith.cmpi ne, %7, %c0_i32_3 : i32
    scf.if %8 {
      %c0 = arith.constant 0 : index
      %c0_4 = arith.constant 0 : index
      %9 = vector.load %arg7[%c0, %c0_4] : memref<8x128xf32, #tpu.memory_space<vmem>>, vector<8x128xf32>
      %c0_5 = arith.constant 0 : index
      %c0_6 = arith.constant 0 : index
      %10 = vector.load %arg5[%c0_5, %c0_6] : memref<8x128xf32, #tpu.memory_space<vmem>>, vector<8x128xf32>
      %c0_7 = arith.constant 0 : index
      %c0_8 = arith.constant 0 : index
      %11 = vector.load %arg6[%c0_7, %c0_8] : memref<128x128xf32, #tpu.memory_space<vmem>>, vector<128x128xf32>
      %cst = arith.constant dense<0.000000e+00> : vector<8x128xf32>
      %12 = tpu.matmul %10, %11, %cst {dimension_numbers = #tpu.dot_dimension_numbers<[1], [0], [0], [1], [0, 0, 1, 1], [], []>} : vector<8x128xf32>, vector<128x128xf32>, vector<8x128xf32> -> vector<8x128xf32>
      %13 = arith.addf %9, %12 : vector<8x128xf32>
      %c0_9 = arith.constant 0 : index
      %c0_10 = arith.constant 0 : index
      %14 = vector.load %arg7[%c0_9, %c0_10] : memref<8x128xf32, #tpu.memory_space<vmem>>, vector<8x128xf32>
      tpu.vector_store %arg7[%c0_9, %c0_10], %13 {strides = array<i32>} : memref<8x128xf32, #tpu.memory_space<vmem>>, vector<8x128xf32>,
    } else {
    }
    return
  }
  func.func @transform_0(%arg0: i32, %arg1: i32, %arg2: i32) -> (i32, i32) {
    %c0_i32 = arith.constant 0 : i32
    %0 = arith.minsi %arg2, %c0_i32 : i32
    %c0_i32_0 = arith.constant 0 : i32
    return %arg0, %0 : i32, i32
  }
  func.func @transform_1(%arg0: i32, %arg1: i32, %arg2: i32) -> (i32, i32) {
    %c0_i32 = arith.constant 0 : i32
    %0 = arith.minsi %arg2, %c0_i32 : i32
    %c0_i32_0 = arith.constant 0 : i32
    return %0, %arg1 : i32, i32
  }
  func.func @transform_2(%arg0: i32, %arg1: i32, %arg2: i32) -> (i32, i32) {
    %c1_i32 = arith.constant 1 : i32
    %0 = arith.subi %arg2, %c1_i32 : i32
    %c0_i32 = arith.constant 0 : i32
    %1 = arith.maxsi %0, %c0_i32 : i32
    %c0_i32_0 = arith.constant 0 : i32
    return %arg0, %1 : i32, i32
  }
  func.func @transform_3(%arg0: i32, %arg1: i32, %arg2: i32) -> (i32, i32) {
    %c1_i32 = arith.constant 1 : i32
    %0 = arith.subi %arg2, %c1_i32 : i32
    %c0_i32 = arith.constant 0 : i32
    %1 = arith.maxsi %0, %c0_i32 : i32
    %c0_i32_0 = arith.constant 0 : i32
    return %1, %arg1 : i32, i32
  }
  func.func @transform_4(%arg0: i32, %arg1: i32, %arg2: i32) -> (i32, i32) {
    %c0_i32 = arith.constant 0 : i32
    return %arg0, %arg1 : i32, i32
  }
}

</mosaic_0001>

<bundles_post_ra>
// kernel: fused_mm_add.1
= control target key start
LH: loop header
LB: loop body
LE: loop exit
PB: predicated region body
PF: predicated region fallthrough
CT: control target
= control target key end

     0   :  { %9 = vsyncpa [#allocation3], 0  ;;  %s941_s15 = smov 0   ;;  %s943_s16 = smov 0   ;;  %s1045_s0 = inlined_call_operand.vmem [shape: f32[8,128], index: 0, kind: input, shape index: {}]   ;;  %s1046_s1 = inlined_call_operand.vmem [shape: f32[128,128], index: 1, kind: input, shape index: {}]   ;;  %s1047_s2 = inlined_call_operand.vmem [shape: f32[8,128], index: 2, kind: input, shape index: {}]   ;;  %s1048_s3 = inlined_call_operand.vmem [shape: f32[128,128], index: 3, kind: input, shape index: {}]   ;;  %s1049_s4 = inlined_call_operand.hbm [shape: f32[8,128], index: 4, kind: output, shape index: {}]  }
   0x1   :  { %s945_s17 = smov 0  }
   0x2 LB: > { %s687_s18 = sadd.s32 4294967295, %s908_s17   ;;  %s27_s19 = sadd.s32 1, %s904_s16  ;;  %s908_s17 = sphi %s945_s17, %s15_s17   ;;  %s904_s16 = sphi %s943_s16, %s1052_s16   ;;  %s900_s15 = sphi %s941_s15, %s1051_s15  }
   0x3   : > { %p28_p0 = scmp.ge.s32.totalorder %s27_s19, 2  ;;  %p694_p1 = scmp.ge.s32.totalorder %s908_s17, 1 }
   0x4   : > { %p274_p2 = scmp.lt.s32.totalorder %s908_s17, 3 }
   0x5   : > { %s1054_s19 = smov (%p28_p0, %s27_s19), 0 }
   0x6   : > { %p275_p3 = pnand %p694_p1, %p274_p2 }
   0x7   : > { %p330_p4 = scmp.lt.s32.totalorder (!%p275_p3), %s900_s15, 0  ;;  %s708_s20 = sadd.s32 (!%p275_p3), 4294967295, %s900_s15 }
   0x8   : > { %278 = sbr.rel (%p275_p3) target bundleno = 513 (0x201), region = 36  ;;  %p368_p5 = scmp.gt.s32.totalorder (!%p275_p3), %s708_s20, 0 }
   0x9   : > { %p711_p8 = scmp.ne.s32.totalorder (!%p275_p3), %s900_s15, 0 }
   0xd   : > { %s331_s21 = scalar_select %p330_p4, %s900_s15, 0 }
   0xe   : > { %s1056_s20 = smov (!%p368_p5, %s708_s20), 0 }
   0xf   : > { %s335_s22 = scalar_select %p330_p4, %s331_s21, 0 }
  0x10   : > { %s699_s23 = sshll.u32 %s331_s21, 4  ;;  %s709_s24 = sshll.u32 %s1056_s20, 4 }
  0x11   : > { %s698_s25 = sshll.u32 %s335_s22, 3  ;;  %p344_p6 = scmp.lt.s32.totalorder %s699_s23, 15 }
  0x12   : > { %s968_s28 = scalar_lea.vmem %s1045_s0, %s698_s25  ;;  %p371_p7 = scmp.lt.s32.totalorder %s709_s24, 15 }
  0x13   : > { %s1058_s23 = smov (!%p344_p6, %s699_s23), 15  ;;  %385 = sbr.rel (%p711_p8) target bundleno = 26 (0x1a), region = 40 }
  0x14   : > { %s1060_s24 = smov (!%p371_p7, %s709_s24), 15  ;;  %s700_s29 = sshll.u32 %s1058_s23, 3 }
  0x15   : > { %s973_s6 = scalar_lea.vmem %s1046_s1, %s700_s29  ;;  %s710_s7 = sshll.u32 %s1060_s24, 3 }
  0x16   : > { %s978_s10 = scalar_lea.vmem %s1048_s3, %s710_s7 }
  0x18   : > { %v910_v0 = vmov 0.0  }
  0x19   : > { %386 = vst [vmem:[#allocation2] sm:$0xff] %v910_v0 }
  0x1a PF: > { %p712_p9 = scmp.ge.s32.totalorder %s900_s15, 1 }
  0x1c   : > { %390 = sbr.rel (%p712_p9) target bundleno = 262 (0x106), region = 44 }
  0x21   : > { %v408_v1 = vld [vmem:[%s973_s6 + $0x78] sm:$0xff]  ;;  %v911_v2 = vmov 0.0   ;;  %v407_v3 = vld [vmem:[%s973_s6 + $0x70] sm:$0xff]  ;;  %vm912_vm0 = vmmov 0   ;;  %v406_v4 = vld [vmem:[%s973_s6 + $0x68] sm:$0xff] }
  0x22   : > { %752 = vmatprep.subr.mxu0 %v911_v2  ;;  %784 = vmatprep.mubr.msk.f32.mxu0 %vm912_vm0, %v911_v2  ;;  %v405_v5 = vld [vmem:[%s973_s6 + $0x60] sm:$0xff]  ;;  %v404_v6 = vld [vmem:[%s973_s6 + $0x58] sm:$0xff]  ;;  %v403_v7 = vld [vmem:[%s973_s6 + $0x50] sm:$0xff] }
  0x23   : > { %753 = vmatpush3.msra.mxu0 %v408_v1  ;;  %v402_v8 = vld [vmem:[%s973_s6 + $0x48] sm:$0xff]  ;;  %v401_v9 = vld [vmem:[%s973_s6 + $0x40] sm:$0xff]  ;;  %v400_v10 = vld [vmem:[%s973_s6 + $0x38] sm:$0xff] }
  0x24   : > { %754 = vmatprep.subr.mxu0 %v911_v2  ;;  %v399_v11 = vld [vmem:[%s973_s6 + $0x30] sm:$0xff]  ;;  %v398_v12 = vld [vmem:[%s973_s6 + $0x28] sm:$0xff]  ;;  %v397_v13 = vld [vmem:[%s973_s6 + $0x20] sm:$0xff] }
  0x25   : > { %755 = vmatpush3.msra.mxu0 %v407_v3  ;;  %v396_v14 = vld [vmem:[%s973_s6 + $0x18] sm:$0xff]  ;;  %v395_v15 = vld [vmem:[%s973_s6 + $0x10] sm:$0xff]  ;;  %v394_v16 = vld [vmem:[%s973_s6 + $0x8] sm:$0xff] }
  0x26   : > { %756 = vmatprep.subr.mxu0 %v911_v2  ;;  %v393_v17 = vld [vmem:[%s973_s6] sm:$0xff] }
  0x27   : > { %757 = vmatpush3.msra.mxu0 %v406_v4  ;;  %v392_v18 = vld [vmem:[%s968_s28] sm:$0xff] }
  0x28   : > { %758 = vmatprep.subr.mxu0 %v911_v2  ;;  %v391_v19 = vld [vmem:[#allocation2] sm:$0xff] }
  0x29   : > { %759 = vmatpush3.msra.mxu0 %v405_v5 }
  0x2a   : > { %760 = vmatprep.subr.mxu0 %v911_v2 }
  0x2b   : > { %761 = vmatpush3.msra.mxu0 %v404_v6 }
  0x2c   : > { %762 = vmatprep.subr.mxu0 %v911_v2 }
  0x2d   : > { %763 = vmatpush3.msra.mxu0 %v403_v7 }
  0x2e   : > { %764 = vmatprep.subr.mxu0 %v911_v2 }
  0x2f   : > { %765 = vmatpush3.msra.mxu0 %v402_v8 }
  0x30   : > { %766 = vmatprep.subr.mxu0 %v911_v2 }
  0x31   : > { %767 = vmatpush3.msra.mxu0 %v401_v9 }
  0x32   : > { %768 = vmatprep.subr.mxu0 %v911_v2 }
  0x33   : > { %769 = vmatpush3.msra.mxu0 %v400_v10 }
  0x34   : > { %770 = vmatprep.subr.mxu0 %v911_v2 }
  0x35   : > { %771 = vmatpush3.msra.mxu0 %v399_v11 }
  0x36   : > { %772 = vmatprep.subr.mxu0 %v911_v2 }
  0x37   : > { %773 = vmatpush3.msra.mxu0 %v398_v12 }
  0x38   : > { %774 = vmatprep.subr.mxu0 %v911_v2 }
  0x39   : > { %775 = vmatpush3.msra.mxu0 %v397_v13 }
  0x3a   : > { %776 = vmatprep.subr.mxu0 %v911_v2 }
  0x3b   : > { %777 = vmatpush3.msra.mxu0 %v396_v14 }
  0x3c   : > { %778 = vmatprep.subr.mxu0 %v911_v2 }
  0x3d   : > { %779 = vmatpush3.msra.mxu0 %v395_v15 }
  0x3e   : > { %780 = vmatprep.subr.mxu0 %v911_v2 }
  0x3f   : > { %781 = vmatpush3.msra.mxu0 %v394_v16 }
  0x40   : > { %782 = vmatprep.subr.mxu0 %v911_v2 }
  0x41   : > { %783 = vmatpush3.msra.mxu0 %v393_v17 }
  0x42   : > { %785 = vmatmul.mubr.f32.vlgmr.msra.gmra.mxu0 %v392_v18 }
 0x102   : > { %v475_v20 = vpop.f32.mrf.mxu0 }
 0x103   : > { %v479_v21 = vadd.f32 %v475_v20, %v391_v19 }
 0x104   : > { %v786_v22 = vpop.f32.mrf.mxu0 }
 0x105   : > { %480 = vst [vmem:[#allocation2] sm:$0xff] %v479_v21 }
 0x106 PF: > { %p713_p10 = scmp.lt.s32.totalorder %s900_s15, 1 }
 0x108   : > { %484 = sbr.rel (%p713_p10) target bundleno = 498 (0x1f2), region = 48 }
 0x10d   : > { %v502_v23 = vld [vmem:[%s978_s10 + $0x78] sm:$0xff]  ;;  %v913_v24 = vmov 0.0   ;;  %v501_v25 = vld [vmem:[%s978_s10 + $0x70] sm:$0xff]  ;;  %vm914_vm1 = vmmov 0   ;;  %v500_v26 = vld [vmem:[%s978_s10 + $0x68] sm:$0xff] }
 0x10e   : > { %787 = vmatprep.subr.mxu0 %v913_v24  ;;  %819 = vmatprep.mubr.msk.f32.mxu0 %vm914_vm1, %v913_v24  ;;  %v499_v27 = vld [vmem:[%s978_s10 + $0x60] sm:$0xff]  ;;  %v498_v28 = vld [vmem:[%s978_s10 + $0x58] sm:$0xff]  ;;  %v497_v29 = vld [vmem:[%s978_s10 + $0x50] sm:$0xff] }
 0x10f   : > { %788 = vmatpush3.msra.mxu0 %v502_v23  ;;  %v496_v30 = vld [vmem:[%s978_s10 + $0x48] sm:$0xff]  ;;  %v495_v31 = vld [vmem:[%s978_s10 + $0x40] sm:$0xff]  ;;  %v494_v32 = vld [vmem:[%s978_s10 + $0x38] sm:$0xff] }
 0x110   : > { %789 = vmatprep.subr.mxu0 %v913_v24  ;;  %v493_v33 = vld [vmem:[%s978_s10 + $0x30] sm:$0xff]  ;;  %v492_v34 = vld [vmem:[%s978_s10 + $0x28] sm:$0xff]  ;;  %v491_v35 = vld [vmem:[%s978_s10 + $0x20] sm:$0xff] }
 0x111   : > { %790 = vmatpush3.msra.mxu0 %v501_v25  ;;  %v490_v36 = vld [vmem:[%s978_s10 + $0x18] sm:$0xff]  ;;  %v489_v37 = vld [vmem:[%s978_s10 + $0x10] sm:$0xff]  ;;  %v488_v38 = vld [vmem:[%s978_s10 + $0x8] sm:$0xff] }
 0x112   : > { %791 = vmatprep.subr.mxu0 %v913_v24  ;;  %v487_v39 = vld [vmem:[%s978_s10] sm:$0xff] }
 0x113   : > { %792 = vmatpush3.msra.mxu0 %v500_v26  ;;  %v486_v40 = vld [vmem:[%s1047_s2] sm:$0xff] }
 0x114   : > { %793 = vmatprep.subr.mxu0 %v913_v24  ;;  %v485_v41 = vld [vmem:[#allocation2] sm:$0xff] }
 0x115   : > { %794 = vmatpush3.msra.mxu0 %v499_v27 }
 0x116   : > { %795 = vmatprep.subr.mxu0 %v913_v24 }
 0x117   : > { %796 = vmatpush3.msra.mxu0 %v498_v28 }
 0x118   : > { %797 = vmatprep.subr.mxu0 %v913_v24 }
 0x119   : > { %798 = vmatpush3.msra.mxu0 %v497_v29 }
 0x11a   : > { %799 = vmatprep.subr.mxu0 %v913_v24 }
 0x11b   : > { %800 = vmatpush3.msra.mxu0 %v496_v30 }
 0x11c   : > { %801 = vmatprep.subr.mxu0 %v913_v24 }
 0x11d   : > { %802 = vmatpush3.msra.mxu0 %v495_v31 }
 0x11e   : > { %803 = vmatprep.subr.mxu0 %v913_v24 }
 0x11f   : > { %804 = vmatpush3.msra.mxu0 %v494_v32 }
 0x120   : > { %805 = vmatprep.subr.mxu0 %v913_v24 }
 0x121   : > { %806 = vmatpush3.msra.mxu0 %v493_v33 }
 0x122   : > { %807 = vmatprep.subr.mxu0 %v913_v24 }
 0x123   : > { %808 = vmatpush3.msra.mxu0 %v492_v34 }
 0x124   : > { %809 = vmatprep.subr.mxu0 %v913_v24 }
 0x125   : > { %810 = vmatpush3.msra.mxu0 %v491_v35 }
 0x126   : > { %811 = vmatprep.subr.mxu0 %v913_v24 }
 0x127   : > { %812 = vmatpush3.msra.mxu0 %v490_v36 }
 0x128   : > { %813 = vmatprep.subr.mxu0 %v913_v24 }
 0x129   : > { %814 = vmatpush3.msra.mxu0 %v489_v37 }
 0x12a   : > { %815 = vmatprep.subr.mxu0 %v913_v24 }
 0x12b   : > { %816 = vmatpush3.msra.mxu0 %v488_v38 }
 0x12c   : > { %817 = vmatprep.subr.mxu0 %v913_v24 }
 0x12d   : > { %818 = vmatpush3.msra.mxu0 %v487_v39 }
 0x12e   : > { %820 = vmatmul.mubr.f32.vlgmr.msra.gmra.mxu0 %v486_v40 }
 0x1ee   : > { %v569_v42 = vpop.f32.mrf.mxu0 }
 0x1ef   : > { %v573_v43 = vadd.f32 %v569_v42, %v485_v41 }
 0x1f0   : > { %v821_v44 = vpop.f32.mrf.mxu0 }
 0x1f1   : > { %574 = vst [vmem:[#allocation2] sm:$0xff] %v573_v43 }
 0x1f2 PF: > { %p1021_p11 = scmp.eq.s32.totalorder %s687_s18, 1  ;;  %s915_s14 = smov [#allocation2]  }
 0x1f3   : > { %s585_s15 = sshll.u32 %s915_s14, 4  ;;  %s586_s15 = int_to_ptr.vmem [resolvable:$true] %s585_s15 }
 0x1f4   : > { %s858_s20 = scalar_lea.vmem %s586_s15, 128  ;;  %p865_p1 = scmp.lt.s32.totalorder %s586_s15, %s586_s15 }
 0x1f5   : > { %p859_p12 = scmp.ne.s32.totalorder %s586_s15, %s858_s20  ;;  %p866_p2 = scmp.lt.s32.totalorder %s858_s20, %s858_s20 }
 0x1f7   : > { %p860_p13 = pnand %p859_p12, %p1021_p11  ;;  %p867_p3 = por %p866_p2, %p865_p1 }
 0x1f9   : > { %p861_p0 = pneg %p860_p13 }
 0x1fb   : > { %p868_p4 = pnand %p867_p3, %p861_p0 }
 0x1fd   : > { %871 = shalt.err (!%p868_p4)
}
 0x1fe   : > { %823 = dma.vmem_to_hbm [thread:$0]  (%p1021_p11), %s586_s15, 128, %s1049_s4, [#allocation3]  }
 0x1ff   : > { %895 = dma.done.wait (%p1021_p11), [#allocation3], 128  }
 0x200   : > { %897 = vsyncadd (%p1021_p11), [#allocation3], 4294967168 }
 0x201 PF: > { %s15_s17 = sadd.s32 1, %s908_s17   ;;  %s1051_s15 = smov %s904_s16 }
 0x202   : > { %p12_p5 = scmp.ge.s32.totalorder %s15_s17, 4   ;;  %s1052_s16 = smov %s1054_s19 }
 0x204   :  { %14 = sbr.rel (!%p12_p5) target bundleno = 2 (0x2), region = 85 }
 0x209   :  { %598 = vsyncpa [#allocation3], 1 }
 0x20a   :  { %600 = vsyncpa [#allocation3 + $0x1], 1 }

</bundles_post_ra>
